<compile_context>
chip_gen: v5e
topology: v5e:2x2
jax: 0.10.0
libtpu: 0.0.40
codegen_flags: <defaults>
</compile_context>

<pallas_src>
import functools

import jax
import jax.numpy as jnp
from jax import lax
from jax.experimental import pallas as pl
from jax.experimental.pallas import tpu as pltpu


def _round_up(n, m):
    return (n + m - 1) // m * m


def _cdiv(a, b):
    return -(-a // b)


def _pick_batch_tile(B, max_tile):
    # Aim for >= 8 grid steps at large B (>= 2x TensorCores on v7x plus
    # pipeline overlap); keep TB a multiple of 128 when >= 128 (MXU-M, bf16
    # sublane packing) and bound batch padding waste to < one tile.
    # Note: grid parallelism is a no-op on single-TC v5e/v6e, but the >=8-way
    # split still buys DMA/compute overlap there without hurting MXU shape.
    if B < 128:
        return _round_up(B, 8)  # single small tile; grid parallelism is moot
    return min(max_tile, max(128, _round_up(_cdiv(B, 8), 128)))


def _mlp_kernel(x_ref, w1_ref, b1_ref, w2_ref, b2_ref, o_ref, acc_ref=None,
                *, out_features, num_k):
    # x tile [TB, IN] f32 -> bf16 in-register (cheap VPU work hidden under the
    # DMA, vs. a separate host-side cast pass over HBM); weights bf16; biases
    # f32; MXU accumulates in f32.
    x = x_ref[...].astype(jnp.bfloat16)

    h = jnp.dot(x, w1_ref[...], preferred_element_type=jnp.float32) + b1_ref[...]
    h = jnp.maximum(h, 0.0)                                   # ReLU (f32, VPU)
    logits = jnp.dot(h.astype(jnp.bfloat16), w2_ref[...],
                     preferred_element_type=jnp.float32)

    def _finish(y):
        y = y + b2_ref[...]
        out_p = y.shape[-1]
        if out_p != out_features:  # static: only when OUT was padded to 128k
            lane = lax.broadcasted_iota(jnp.int32, y.shape, 1)
            y = jnp.where(lane < out_features, y, -jnp.inf)
        # Numerically stable softmax over dim=1; exp(-inf) = 0 on padded lanes.
        y = y - jnp.max(y, axis=1, keepdims=True)
        e = jnp.exp(y)
        inv = pl.reciprocal(jnp.sum(e, axis=1, keepdims=True), approx=True)
        o_ref[...] = (e * inv).astype(o_ref.dtype)

    if num_k == 1:
        _finish(logits)                       # no accumulator round-trip
    else:
        # Hidden-dim (K) split: ReLU is elementwise per hidden unit, so summing
        # partial hidden-slab contributions to the logits is exact.
        k = pl.program_id(1)

        @pl.when(k == 0)
        def _():
            acc_ref[...] = jnp.zeros_like(acc_ref)

        acc_ref[...] += logits

        @pl.when(k == num_k - 1)
        def _():
            _finish(acc_ref[...])


def mlp_forward(x, w1_t, b1, w2_t, b2, *, max_batch_tile=512):
    """x: [B, in]; w1_t: [in, hid]; b1: [1, hid]; w2_t: [hid, out]; b2: [1, out]."""
    B, IN = x.shape
    HID = w1_t.shape[1]
    OUT = w2_t.shape[1]

    # ---- per-generation VMEM budget ----
    try:
        vmem_cap = int(pltpu.get_tpu_info().vmem_capacity_bytes)
    except Exception:
        vmem_cap = 64 * 2**20  # conservative fallback: v7x per-TC VMEM
    vmem_usable = (vmem_cap * 3) // 4  # ~48 MiB on v7x, ~96 MiB on v5e/v6e

    # ---- layout decisions (pure glue) ----
    # Output: lane-dense (128-multiple) only when OUT is already large; tiny
    # OUT (e.g. 2 actions) uses a compact slab to avoid OUT_P/OUT x HBM write
    # amplification (and needs no softmax lane masking).
    OUT_P = _round_up(OUT, 128) if OUT >= 128 else OUT
    TB = _pick_batch_tile(B, max_batch_tile)
    B_pad = _round_up(B, TB)
    n_b = B_pad // TB

    # Hidden dim: pad to a multiple of 256 once it is large (full MXU width on
    # v6e/v7x, still 128-aligned for v5e); tiny HID stays full-extent.
    HID_P = _round_up(HID, 256) if HID >= 128 else HID

    act_bytes = (2 * TB * IN * 4        # x tiles (f32, double-buffered)
                 + 2 * TB * OUT_P * 4   # out tiles (f32, double-buffered)
                 + TB * OUT_P * 4       # f32 logits accumulator (worst case)
                 + OUT_P * 4)           # b2 (f32, single-buffered)
    weight_budget = vmem_usable - act_bytes
    hid_col_bytes = (IN + OUT_P) * 2 + 4  # bf16 w1 col + bf16 w2 row + f32 b1

    if weight_budget > 0 and HID_P * hid_col_bytes <= weight_budget:
        THID, n_k = HID_P, 1              # weights fully VMEM-resident
    else:
        # K-split: tile w1 by columns / w2 by rows; weights never fully resident.
        THID = max(HID_P, 256)
        while THID > 256 and 2 * THID * hid_col_bytes > weight_budget:
            THID = max(256, _round_up(THID // 2, 256))
        n_k = _cdiv(HID_P, THID)
        HID_P = n_k * THID
        # TODO(synk): also tile IN if a single 256-wide hidden slab still
        # overflows VMEM (enormous input widths).

    w_bufs = 1 if n_k == 1 else 2         # resident weights vs. pipelined K tiles
    est = (act_bytes
           + w_bufs * (IN * THID + THID * OUT_P) * 2   # bf16 weights
           + w_bufs * THID * 4)                        # f32 b1
    if est > vmem_usable:
        raise ValueError(
            f"MLP tile footprint {est} B exceeds usable VMEM {vmem_usable} B; "
            "reduce max_batch_tile or add IN-dim tiling.")
    vmem_limit = int(min(vmem_usable, max(2 * est, 16 * 2**20)))

    # ---- host-side padding (zero pads are exact through ReLU / softmax) ----
    x_f = x.astype(jnp.float32)
    if B_pad != B:
        x_f = jnp.pad(x_f, ((0, B_pad - B), (0, 0)))
    w1_bf = jnp.pad(w1_t, ((0, 0), (0, HID_P - HID))).astype(jnp.bfloat16)
    b1_f = jnp.pad(b1.astype(jnp.float32).reshape(1, HID),
                   ((0, 0), (0, HID_P - HID)))            # zero pad (required)
    w2_bf = jnp.pad(w2_t, ((0, HID_P - HID), (0, OUT_P - OUT))).astype(jnp.bfloat16)
    b2_f = jnp.pad(b2.astype(jnp.float32).reshape(1, OUT),
                   ((0, 0), (0, OUT_P - OUT)))

    kernel = functools.partial(_mlp_kernel, out_features=OUT, num_k=n_k)

    def _spec(shape, imap, mode):
        if mode is None:
            return pl.BlockSpec(shape, imap)
        return pl.BlockSpec(shape, imap, pipeline_mode=mode)

    def _call(single_buffer_resident):
        # Constant-index-map operands only need one VMEM buffer.
        const = pl.Buffered(1) if single_buffer_resident else None
        if n_k == 1:
            w1_spec = _spec((IN, HID_P), lambda i, k: (0, 0), const)
            b1_spec = _spec((1, HID_P), lambda i, k: (0, 0), const)
            w2_spec = _spec((HID_P, OUT_P), lambda i, k: (0, 0), const)
        else:
            w1_spec = pl.BlockSpec((IN, THID), lambda i, k: (0, k))
            b1_spec = pl.BlockSpec((1, THID), lambda i, k: (0, k))
            w2_spec = pl.BlockSpec((THID, OUT_P), lambda i, k: (k, 0))
        b2_spec = _spec((1, OUT_P), lambda i, k: (0, 0), const)
        scratch = [] if n_k == 1 else [pltpu.VMEM((TB, OUT_P), jnp.float32)]
        return pl.pallas_call(
            kernel,
            out_shape=jax.ShapeDtypeStruct((B_pad, OUT_P), jnp.float32),
            grid=(n_b, n_k),                       # reduction (K) axis last
            in_specs=[
                pl.BlockSpec((TB, IN), lambda i, k: (i, 0)),  # x: batch-tiled, f32
                w1_spec, b1_spec, w2_spec, b2_spec,
            ],
            out_specs=pl.BlockSpec((TB, OUT_P), lambda i, k: (i, 0)),
            scratch_shapes=scratch,
            compiler_params=pltpu.CompilerParams(
                dimension_semantics=("parallel", "arbitrary"),
                vmem_limit_bytes=vmem_limit,
            ),
        )(x_f, w1_bf, b1_f, w2_bf, b2_f)

    try:
        out_padded = _call(True)
    except Exception:
        # Fallback for JAX builds where BlockSpec(pipeline_mode=pl.Buffered(1))
        # is not supported on the pallas_call path: default double-buffering.
        out_padded = _call(False)

    return out_padded[:B, :OUT]


def init_params(key, input_size, outputs):
    """Deterministic init matching PyTorch nn.Linear default U(-1/sqrt(fan_in), 1/sqrt(fan_in))."""
    hidden = input_size * 2
    k1, k2, k3, k4 = jax.random.split(key, 4)
    bound1 = 1.0 / jnp.sqrt(jnp.float32(input_size))
    bound2 = 1.0 / jnp.sqrt(jnp.float32(hidden))
    # Stored directly as [in, out] (transposed vs. PyTorch's [out, in]) — pure glue.
    w1_t = jax.random.uniform(k1, (input_size, hidden), jnp.float32, -bound1, bound1)
    b1 = jax.random.uniform(k2, (1, hidden), jnp.float32, -bound1, bound1)
    w2_t = jax.random.uniform(k3, (hidden, outputs), jnp.float32, -bound2, bound2)
    b2 = jax.random.uniform(k4, (1, outputs), jnp.float32, -bound2, bound2)
    return w1_t, b1, w2_t, b2


if __name__ == "__main__":
    # Cartpole-like sizes: 4-dim state, 2 actions, batch of 8.
    # NOTE: at this toy size the kernel is pure launch overhead; the tiling /
    # bf16 / K-split / compact-output machinery pays off at realistic sizes.
    batch, input_size, outputs = 8, 4, 2

    key = jax.random.PRNGKey(0)
    kx, kp = jax.random.split(key)
    x = jax.random.normal(kx, (batch, input_size), jnp.float32)
    w1_t, b1, w2_t, b2 = init_params(kp, input_size, outputs)

    out = mlp_forward(x, w1_t, b1, w2_t, b2)
    out = jax.block_until_ready(out)

    # Sanity check against a plain-JAX f32 reference (kernel uses bf16 matmul
    # operands + approximate reciprocal, hence the looser tolerance).
    h_ref = jnp.maximum(x @ w1_t + b1, 0.0)
    ref = jax.nn.softmax(h_ref @ w2_t + b2, axis=1)
    assert out.shape == (batch, outputs)
    assert jnp.allclose(out, ref, atol=2e-2, rtol=0.0)
    assert jnp.allclose(jnp.sum(out, axis=1), 1.0, atol=5e-3)

    print("KERNEL_OK")
</pallas_src>

<mosaic_0001>
module attributes {stable_mosaic.version = 11 : i64} {
  func.func @_mlp_kernel(%arg0: i32, %arg1: i32, %arg2: memref<8x4xf32, #tpu.memory_space<vmem>>, %arg3: memref<4x8xbf16, #tpu.memory_space<vmem>>, %arg4: memref<1x8xf32, #tpu.memory_space<vmem>>, %arg5: memref<8x2xbf16, #tpu.memory_space<vmem>>, %arg6: memref<1x2xf32, #tpu.memory_space<vmem>>, %arg7: memref<8x2xf32, #tpu.memory_space<vmem>>) attributes {dimension_semantics = [#tpu.dimension_semantics<parallel>, #tpu.dimension_semantics<arbitrary>], iteration_bounds = array<i64: 1, 1>, scalar_prefetch = 0 : i64, scratch_operands = 0 : i64, tpu.core_type = #tpu.core_type<tc>, window_params = [{transform_indices = @transform_0, window_bounds = array<i64: 8, 4>}, {pipeline_mode = #tpu.pipeline_mode<synchronous>, transform_indices = @transform_1, window_bounds = array<i64: 4, 8>}, {pipeline_mode = #tpu.pipeline_mode<synchronous>, transform_indices = @transform_2, window_bounds = array<i64: 1, 8>}, {pipeline_mode = #tpu.pipeline_mode<synchronous>, transform_indices = @transform_3, window_bounds = array<i64: 8, 2>}, {pipeline_mode = #tpu.pipeline_mode<synchronous>, transform_indices = @transform_4, window_bounds = array<i64: 1, 2>}, {transform_indices = @transform_5, window_bounds = array<i64: 8, 2>}]} {
    %c0 = arith.constant 0 : index
    %c0_0 = arith.constant 0 : index
    %0 = vector.load %arg2[%c0, %c0_0] : memref<8x4xf32, #tpu.memory_space<vmem>>, vector<8x4xf32>
    %1 = arith.truncf %0 : vector<8x4xf32> to vector<8x4xbf16>
    %c0_1 = arith.constant 0 : index
    %c0_2 = arith.constant 0 : index
    %2 = vector.load %arg3[%c0_1, %c0_2] : memref<4x8xbf16, #tpu.memory_space<vmem>>, vector<4x8xbf16>
    %cst = arith.constant dense<0.000000e+00> : vector<8x8xf32>
    %3 = tpu.matmul %1, %2, %cst {dimension_numbers = #tpu.dot_dimension_numbers<[1], [0], [0], [1], [0, 0, 1, 1], [], []>} : vector<8x4xbf16>, vector<4x8xbf16>, vector<8x8xf32> -> vector<8x8xf32>
    %c0_3 = arith.constant 0 : index
    %c0_4 = arith.constant 0 : index
    %4 = vector.load %arg4[%c0_3, %c0_4] : memref<1x8xf32, #tpu.memory_space<vmem>>, vector<1x8xf32>
    %5 = vector.broadcast %4 : vector<1x8xf32> to vector<8x8xf32>
    %6 = arith.addf %3, %5 : vector<8x8xf32>
    %cst_5 = arith.constant 0.000000e+00 : f32
    %7 = vector.broadcast %cst_5 : f32 to vector<8x8xf32>
    %8 = arith.maximumf %6, %7 : vector<8x8xf32>
    %9 = arith.truncf %8 : vector<8x8xf32> to vector<8x8xbf16>
    %c0_6 = arith.constant 0 : index
    %c0_7 = arith.constant 0 : index
    %10 = vector.load %arg5[%c0_6, %c0_7] : memref<8x2xbf16, #tpu.memory_space<vmem>>, vector<8x2xbf16>
    %cst_8 = arith.constant dense<0.000000e+00> : vector<8x2xf32>
    %11 = tpu.matmul %9, %10, %cst_8 {dimension_numbers = #tpu.dot_dimension_numbers<[1], [0], [0], [1], [0, 0, 1, 1], [], []>} : vector<8x8xbf16>, vector<8x2xbf16>, vector<8x2xf32> -> vector<8x2xf32>
    %c0_9 = arith.constant 0 : index
    %c0_10 = arith.constant 0 : index
    %12 = vector.load %arg6[%c0_9, %c0_10] : memref<1x2xf32, #tpu.memory_space<vmem>>, vector<1x2xf32>
    %13 = vector.broadcast %12 : vector<1x2xf32> to vector<8x2xf32>
    %14 = arith.addf %11, %13 : vector<8x2xf32>
    %cst_11 = arith.constant dense<0xFF800000> : vector<8xf32>
    %15 = vector.multi_reduction <maximumf>, %14, %cst_11 [1] : vector<8x2xf32> to vector<8xf32>
    %16 = vector.shape_cast %15 : vector<8xf32> to vector<8x1xf32>
    %17 = vector.broadcast %16 : vector<8x1xf32> to vector<8x2xf32>
    %18 = arith.subf %14, %17 : vector<8x2xf32>
    %19 = math.exp %18 : vector<8x2xf32>
    %cst_12 = arith.constant dense<0.000000e+00> : vector<8xf32>
    %20 = vector.multi_reduction <add>, %19, %cst_12 [1] : vector<8x2xf32> to vector<8xf32>
    %21 = vector.shape_cast %20 : vector<8xf32> to vector<8x1xf32>
    %22 = tpu.reciprocal %21 {approx = true} : vector<8x1xf32> -> vector<8x1xf32>
    %23 = vector.broadcast %22 : vector<8x1xf32> to vector<8x2xf32>
    %24 = arith.mulf %19, %23 : vector<8x2xf32>
    %c0_13 = arith.constant 0 : index
    %c0_14 = arith.constant 0 : index
    %25 = vector.load %arg7[%c0_13, %c0_14] : memref<8x2xf32, #tpu.memory_space<vmem>>, vector<8x2xf32>
    tpu.vector_store %arg7[%c0_13, %c0_14], %24 {strides = array<i32>} : memref<8x2xf32, #tpu.memory_space<vmem>>, vector<8x2xf32>,
    return
  }
  func.func @transform_0(%arg0: i32, %arg1: i32) -> (i32, i32) {
    %c0_i32 = arith.constant 0 : i32
    %c0_i32_0 = arith.constant 0 : i32
    return %arg0, %c0_i32 : i32, i32
  }
  func.func @transform_1(%arg0: i32, %arg1: i32) -> (i32, i32) {
    %c0_i32 = arith.constant 0 : i32
    %c0_i32_0 = arith.constant 0 : i32
    %c0_i32_1 = arith.constant 0 : i32
    return %c0_i32, %c0_i32_0 : i32, i32
  }
  func.func @transform_2(%arg0: i32, %arg1: i32) -> (i32, i32) {
    %c0_i32 = arith.constant 0 : i32
    %c0_i32_0 = arith.constant 0 : i32
    %c0_i32_1 = arith.constant 0 : i32
    return %c0_i32, %c0_i32_0 : i32, i32
  }
  func.func @transform_3(%arg0: i32, %arg1: i32) -> (i32, i32) {
    %c0_i32 = arith.constant 0 : i32
    %c0_i32_0 = arith.constant 0 : i32
    %c0_i32_1 = arith.constant 0 : i32
    return %c0_i32, %c0_i32_0 : i32, i32
  }
  func.func @transform_4(%arg0: i32, %arg1: i32) -> (i32, i32) {
    %c0_i32 = arith.constant 0 : i32
    %c0_i32_0 = arith.constant 0 : i32
    %c0_i32_1 = arith.constant 0 : i32
    return %c0_i32, %c0_i32_0 : i32, i32
  }
  func.func @transform_5(%arg0: i32, %arg1: i32) -> (i32, i32) {
    %c0_i32 = arith.constant 0 : i32
    %c0_i32_0 = arith.constant 0 : i32
    return %arg0, %c0_i32 : i32, i32
  }
}

module attributes {stable_mosaic.version = 11 : i64} {
  func.func @_mlp_kernel(%arg0: i32, %arg1: i32, %arg2: memref<8x4xf32, #tpu.memory_space<vmem>>, %arg3: memref<4x8xbf16, #tpu.memory_space<vmem>>, %arg4: memref<1x8xf32, #tpu.memory_space<vmem>>, %arg5: memref<8x2xbf16, #tpu.memory_space<vmem>>, %arg6: memref<1x2xf32, #tpu.memory_space<vmem>>, %arg7: memref<8x2xf32, #tpu.memory_space<vmem>>) attributes {dimension_semantics = [#tpu.dimension_semantics<parallel>, #tpu.dimension_semantics<arbitrary>], iteration_bounds = array<i64: 1, 1>, scalar_prefetch = 0 : i64, scratch_operands = 0 : i64, tpu.core_type = #tpu.core_type<tc>, window_params = [{transform_indices = @transform_0, window_bounds = array<i64: 8, 4>}, {pipeline_mode = #tpu.pipeline_mode<synchronous>, transform_indices = @transform_1, window_bounds = array<i64: 4, 8>}, {pipeline_mode = #tpu.pipeline_mode<synchronous>, transform_indices = @transform_2, window_bounds = array<i64: 1, 8>}, {pipeline_mode = #tpu.pipeline_mode<synchronous>, transform_indices = @transform_3, window_bounds = array<i64: 8, 2>}, {pipeline_mode = #tpu.pipeline_mode<synchronous>, transform_indices = @transform_4, window_bounds = array<i64: 1, 2>}, {transform_indices = @transform_5, window_bounds = array<i64: 8, 2>}]} {
    %c0 = arith.constant 0 : index
    %c0_0 = arith.constant 0 : index
    %0 = vector.load %arg2[%c0, %c0_0] : memref<8x4xf32, #tpu.memory_space<vmem>>, vector<8x4xf32>
    %1 = arith.truncf %0 : vector<8x4xf32> to vector<8x4xbf16>
    %c0_1 = arith.constant 0 : index
    %c0_2 = arith.constant 0 : index
    %2 = vector.load %arg3[%c0_1, %c0_2] : memref<4x8xbf16, #tpu.memory_space<vmem>>, vector<4x8xbf16>
    %cst = arith.constant dense<0.000000e+00> : vector<8x8xf32>
    %3 = tpu.matmul %1, %2, %cst {dimension_numbers = #tpu.dot_dimension_numbers<[1], [0], [0], [1], [0, 0, 1, 1], [], []>} : vector<8x4xbf16>, vector<4x8xbf16>, vector<8x8xf32> -> vector<8x8xf32>
    %c0_3 = arith.constant 0 : index
    %c0_4 = arith.constant 0 : index
    %4 = vector.load %arg4[%c0_3, %c0_4] : memref<1x8xf32, #tpu.memory_space<vmem>>, vector<1x8xf32>
    %5 = vector.broadcast %4 : vector<1x8xf32> to vector<8x8xf32>
    %6 = arith.addf %3, %5 : vector<8x8xf32>
    %cst_5 = arith.constant 0.000000e+00 : f32
    %7 = vector.broadcast %cst_5 : f32 to vector<8x8xf32>
    %8 = arith.maximumf %6, %7 : vector<8x8xf32>
    %9 = arith.truncf %8 : vector<8x8xf32> to vector<8x8xbf16>
    %c0_6 = arith.constant 0 : index
    %c0_7 = arith.constant 0 : index
    %10 = vector.load %arg5[%c0_6, %c0_7] : memref<8x2xbf16, #tpu.memory_space<vmem>>, vector<8x2xbf16>
    %cst_8 = arith.constant dense<0.000000e+00> : vector<8x2xf32>
    %11 = tpu.matmul %9, %10, %cst_8 {dimension_numbers = #tpu.dot_dimension_numbers<[1], [0], [0], [1], [0, 0, 1, 1], [], []>} : vector<8x8xbf16>, vector<8x2xbf16>, vector<8x2xf32> -> vector<8x2xf32>
    %c0_9 = arith.constant 0 : index
    %c0_10 = arith.constant 0 : index
    %12 = vector.load %arg6[%c0_9, %c0_10] : memref<1x2xf32, #tpu.memory_space<vmem>>, vector<1x2xf32>
    %13 = vector.broadcast %12 : vector<1x2xf32> to vector<8x2xf32>
    %14 = arith.addf %11, %13 : vector<8x2xf32>
    %cst_11 = arith.constant dense<0xFF800000> : vector<8xf32>
    %15 = vector.multi_reduction <maximumf>, %14, %cst_11 [1] : vector<8x2xf32> to vector<8xf32>
    %16 = vector.shape_cast %15 : vector<8xf32> to vector<8x1xf32>
    %17 = vector.broadcast %16 : vector<8x1xf32> to vector<8x2xf32>
    %18 = arith.subf %14, %17 : vector<8x2xf32>
    %19 = math.exp %18 : vector<8x2xf32>
    %cst_12 = arith.constant dense<0.000000e+00> : vector<8xf32>
    %20 = vector.multi_reduction <add>, %19, %cst_12 [1] : vector<8x2xf32> to vector<8xf32>
    %21 = vector.shape_cast %20 : vector<8xf32> to vector<8x1xf32>
    %22 = tpu.reciprocal %21 {approx = true} : vector<8x1xf32> -> vector<8x1xf32>
    %23 = vector.broadcast %22 : vector<8x1xf32> to vector<8x2xf32>
    %24 = arith.mulf %19, %23 : vector<8x2xf32>
    %c0_13 = arith.constant 0 : index
    %c0_14 = arith.constant 0 : index
    %25 = vector.load %arg7[%c0_13, %c0_14] : memref<8x2xf32, #tpu.memory_space<vmem>>, vector<8x2xf32>
    tpu.vector_store %arg7[%c0_13, %c0_14], %24 {strides = array<i32>} : memref<8x2xf32, #tpu.memory_space<vmem>>, vector<8x2xf32>,
    return
  }
  func.func @transform_0(%arg0: i32, %arg1: i32) -> (i32, i32) {
    %c0_i32 = arith.constant 0 : i32
    %c0_i32_0 = arith.constant 0 : i32
    return %arg0, %c0_i32 : i32, i32
  }
  func.func @transform_1(%arg0: i32, %arg1: i32) -> (i32, i32) {
    %c0_i32 = arith.constant 0 : i32
    %c0_i32_0 = arith.constant 0 : i32
    %c0_i32_1 = arith.constant 0 : i32
    return %c0_i32, %c0_i32_0 : i32, i32
  }
  func.func @transform_2(%arg0: i32, %arg1: i32) -> (i32, i32) {
    %c0_i32 = arith.constant 0 : i32
    %c0_i32_0 = arith.constant 0 : i32
    %c0_i32_1 = arith.constant 0 : i32
    return %c0_i32, %c0_i32_0 : i32, i32
  }
  func.func @transform_3(%arg0: i32, %arg1: i32) -> (i32, i32) {
    %c0_i32 = arith.constant 0 : i32
    %c0_i32_0 = arith.constant 0 : i32
    %c0_i32_1 = arith.constant 0 : i32
    return %c0_i32, %c0_i32_0 : i32, i32
  }
  func.func @transform_4(%arg0: i32, %arg1: i32) -> (i32, i32) {
    %c0_i32 = arith.constant 0 : i32
    %c0_i32_0 = arith.constant 0 : i32
    %c0_i32_1 = arith.constant 0 : i32
    return %c0_i32, %c0_i32_0 : i32, i32
  }
  func.func @transform_5(%arg0: i32, %arg1: i32) -> (i32, i32) {
    %c0_i32 = arith.constant 0 : i32
    %c0_i32_0 = arith.constant 0 : i32
    return %arg0, %c0_i32 : i32, i32
  }
}

</mosaic_0001>

<bundles_post_ra>
// kernel: tpu_custom_call.1
= control target key start
LH: loop header
LB: loop body
LE: loop exit
PB: predicated region body
PF: predicated region fallthrough
CT: control target
= control target key end

     0   :  { %vm32_vm0 = vcmask 1041408   ;;  %vm28_vm1 = vcmask 31744   ;;  %vm60_vm2 = vcmask 1043456   ;;  %vm56_vm3 = vcmask 64512   ;;  %s153_s1 = inlined_call_operand.vmem [shape: bf16[4,8], index: 1, kind: input, shape index: {}]   ;;  %s154_s0 = inlined_call_operand.vmem [shape: f32[8,4], index: 0, kind: input, shape index: {}]   ;;  %s155_s2 = inlined_call_operand.vmem [shape: f32[1,8], index: 2, kind: input, shape index: {}]   ;;  %s156_s4 = inlined_call_operand.vmem [shape: f32[1,2], index: 4, kind: input, shape index: {}]   ;;  %s157_s3 = inlined_call_operand.vmem [shape: bf16[8,2], index: 3, kind: input, shape index: {}]   ;;  %s158_s5 = inlined_call_operand.vmem [shape: f32[8,2], index: 5, kind: output, shape index: {}]  }
   0x1   :  { %v23_v0 = vld [vmem:[%s153_s1] sm:$0x3]  ;;  %vm77_vm4 = vcmask 15360  }
   0x2   :  { %v21_v1 = vld [vmem:[%s154_s0] sm:$0xff]  ;;  %v34_v2 = vsel %vm32_vm0, %v23_v0, 0 }
   0x3   :  { %v22_v3 = vpack.c.bf16 %v21_v1, %v21_v1  ;;  %43 = vmatpush.bf16.msra.mxu0 %v34_v2  ;;  %v51_v4 = vld [vmem:[%s157_s3] sm:$0xf] }
   0x4   :  { %v62_v5 = vsel %vm60_vm2, %v51_v4, 0  ;;  %v96_v6 = vld [vmem:[%s155_s2] ss:$0 sm:$0xff] }
   0x5   :  { %71 = vmatpush.bf16.msra.mxu1 %v62_v5  ;;  %v97_v12 = vld [vmem:[%s156_s4] ss:$0 sm:$0xff] }
   0x6   :  { %94 = vmatmul.msk.bf16.vlgmr.msra.gmra.mxu0 %vm28_vm1, %v22_v3 }
  0x83   :  { %v45_v7 = vpop.f32.mrf.mxu0 }
  0x84   :  { %v46_v8 = vadd.f32 %v96_v6, %v45_v7 }
  0x86   :  { %v49_v9 = vmax.f32 %v46_v8, 0.0 }
  0x88   :  { %v50_v10 = vpack.c.bf16 %v49_v9, %v49_v9 }
  0x8a   :  { %95 = vmatmul.msk.bf16.vlgmr.msra.gmra.mxu1 %vm56_vm3, %v50_v10 }
  0x8b   :  { %v47_v11 = vpop.f32.mrf.mxu0 }
 0x107   :  { %v73_v13 = vpop.f32.mrf.mxu1 }
 0x108   :  { %v74_v14 = vadd.f32 %v97_v12, %v73_v13 }
 0x10a   :  { %v78_v15 = vsel %vm77_vm4, %v74_v14, -inf }
 0x10b   :  { %79 = vmax.xlane.f32.xlu0 %v78_v15 }
 0x10f   :  { %v75_v16 = vpop.f32.mrf.mxu1 }
 0x17e   :  { %v80_v17 = vpop.xlane.xlu0 %79 }
 0x17f   :  { %v81_v18 = vsub.f32 %v74_v14, %v80_v17 }
 0x181   :  { %v82_v19 = vmul.f32 1.442695, %v81_v18 }
 0x183   :  { %98 = vpow2.f32 %v82_v19 }
 0x189   :  { %v99_v20 = vpop.eup %98 }
 0x18a   :  { %v84_v21 = vsel %vm77_vm4, %v99_v20, 0.0 }
 0x18b   :  { %85 = vadd.xlane.f32.xlu0 %v84_v21 }
 0x1fe   :  { %v86_v22 = vpop.xlane.xlu0 %85 }
 0x1ff   :  { %100 = vrcp.f32 %v86_v22 }
 0x205   :  { %v101_v23 = vpop.eup %100 }
 0x206   :  { %v88_v24 = vmul.f32 %v101_v23, %v99_v20 }
 0x208   :  { %89 = vst.msk [vmem:[%s158_s5] sm:$0xff] %vm77_vm4, %v88_v24 }

// kernel: tpu_custom_call.1
= control target key start
LH: loop header
LB: loop body
LE: loop exit
PB: predicated region body
PF: predicated region fallthrough
CT: control target
= control target key end

     0   :  { %vm32_vm0 = vcmask 1041408   ;;  %vm28_vm1 = vcmask 31744   ;;  %vm60_vm2 = vcmask 1043456   ;;  %vm56_vm3 = vcmask 64512   ;;  %s153_s1 = inlined_call_operand.vmem [shape: bf16[4,8], index: 1, kind: input, shape index: {}]   ;;  %s154_s0 = inlined_call_operand.vmem [shape: f32[8,4], index: 0, kind: input, shape index: {}]   ;;  %s155_s2 = inlined_call_operand.vmem [shape: f32[1,8], index: 2, kind: input, shape index: {}]   ;;  %s156_s4 = inlined_call_operand.vmem [shape: f32[1,2], index: 4, kind: input, shape index: {}]   ;;  %s157_s3 = inlined_call_operand.vmem [shape: bf16[8,2], index: 3, kind: input, shape index: {}]   ;;  %s158_s5 = inlined_call_operand.vmem [shape: f32[8,2], index: 5, kind: output, shape index: {}]  }
   0x1   :  { %v23_v0 = vld [vmem:[%s153_s1] sm:$0x3]  ;;  %vm77_vm4 = vcmask 15360  }
   0x2   :  { %v21_v1 = vld [vmem:[%s154_s0] sm:$0xff]  ;;  %v34_v2 = vsel %vm32_vm0, %v23_v0, 0 }
   0x3   :  { %v22_v3 = vpack.c.bf16 %v21_v1, %v21_v1  ;;  %43 = vmatpush.bf16.msra.mxu0 %v34_v2  ;;  %v51_v4 = vld [vmem:[%s157_s3] sm:$0xf] }
   0x4   :  { %v62_v5 = vsel %vm60_vm2, %v51_v4, 0  ;;  %v96_v6 = vld [vmem:[%s155_s2] ss:$0 sm:$0xff] }
   0x5   :  { %71 = vmatpush.bf16.msra.mxu1 %v62_v5  ;;  %v97_v12 = vld [vmem:[%s156_s4] ss:$0 sm:$0xff] }
   0x6   :  { %94 = vmatmul.msk.bf16.vlgmr.msra.gmra.mxu0 %vm28_vm1, %v22_v3 }
  0x83   :  { %v45_v7 = vpop.f32.mrf.mxu0 }
  0x84   :  { %v46_v8 = vadd.f32 %v96_v6, %v45_v7 }
  0x86   :  { %v49_v9 = vmax.f32 %v46_v8, 0.0 }
  0x88   :  { %v50_v10 = vpack.c.bf16 %v49_v9, %v49_v9 }
  0x8a   :  { %95 = vmatmul.msk.bf16.vlgmr.msra.gmra.mxu1 %vm56_vm3, %v50_v10 }
  0x8b   :  { %v47_v11 = vpop.f32.mrf.mxu0 }
 0x107   :  { %v73_v13 = vpop.f32.mrf.mxu1 }
 0x108   :  { %v74_v14 = vadd.f32 %v97_v12, %v73_v13 }
 0x10a   :  { %v78_v15 = vsel %vm77_vm4, %v74_v14, -inf }
 0x10b   :  { %79 = vmax.xlane.f32.xlu0 %v78_v15 }
 0x10f   :  { %v75_v16 = vpop.f32.mrf.mxu1 }
 0x17e   :  { %v80_v17 = vpop.xlane.xlu0 %79 }
 0x17f   :  { %v81_v18 = vsub.f32 %v74_v14, %v80_v17 }
 0x181   :  { %v82_v19 = vmul.f32 1.442695, %v81_v18 }
 0x183   :  { %98 = vpow2.f32 %v82_v19 }
 0x189   :  { %v99_v20 = vpop.eup %98 }
 0x18a   :  { %v84_v21 = vsel %vm77_vm4, %v99_v20, 0.0 }
 0x18b   :  { %85 = vadd.xlane.f32.xlu0 %v84_v21 }
 0x1fe   :  { %v86_v22 = vpop.xlane.xlu0 %85 }
 0x1ff   :  { %100 = vrcp.f32 %v86_v22 }
 0x205   :  { %v101_v23 = vpop.eup %100 }
 0x206   :  { %v88_v24 = vmul.f32 %v101_v23, %v99_v20 }
 0x208   :  { %89 = vst.msk [vmem:[%s158_s5] sm:$0xff] %vm77_vm4, %v88_v24 }

</bundles_post_ra>
